<compile_context>
chip_gen: v7x
topology: tpu7x:2x2x1
jax: 0.10.0
libtpu: 0.0.40
codegen_flags: <defaults>
</compile_context>

<pallas_src>
import jax
import jax.numpy as jnp
from jax import lax
from jax.experimental import pallas as pl
from jax.experimental.pallas import tpu as pltpu


def _cdiv(a, b):
    return (a + b - 1) // b


def _round_up(x, m):
    return ((x + m - 1) // m) * m


def _make_gram_kernel(Ds, Dt, tk_s, tk_t, kpc, mask_s, mask_t):
    """Builds the streaming Gram-accumulation kernel with static tile params."""

    def kernel(fs_ref, ft_ref, gs_ref, gt_ref):
        p = pl.program_id(0)       # parallel axis (core split on v7x)
        k = pl.program_id(1)       # reduction axis over K chunks
        chunk = p * kpc + k        # global chunk index along D

        @pl.when(k == 0)
        def _():
            gs_ref[...] = jnp.zeros_like(gs_ref)
            gt_ref[...] = jnp.zeros_like(gt_ref)

        fs = fs_ref[...]           # (B, tk_s), native dtype feeds MXU directly
        ft = ft_ref[...]           # (B, tk_t)

        # Zero the out-of-bounds tail columns of the final (partial) chunk.
        # Zeros are Gram-neutral; for full chunks the predicate is all-True.
        # This compare+select hides under the per-step DMA (mem-bound kernel).
        if mask_s:
            col = lax.broadcasted_iota(jnp.int32, fs.shape, 1)
            fs = jnp.where(col < (Ds - chunk * tk_s), fs, jnp.zeros_like(fs))
        if mask_t:
            col = lax.broadcasted_iota(jnp.int32, ft.shape, 1)
            ft = jnp.where(col < (Dt - chunk * tk_t), ft, jnp.zeros_like(ft))

        # Gram chunk: contract axis 1 of both operands (fs @ fs.T without an
        # explicit transpose of the streamed chunk), f32 accumulation.
        dn = (((1,), (1,)), ((), ()))
        gs_ref[...] += lax.dot_general(fs, fs, dn,
                                       preferred_element_type=jnp.float32)
        gt_ref[...] += lax.dot_general(ft, ft, dn,
                                       preferred_element_type=jnp.float32)

    return kernel


def _epilogue_kernel(gs_ref, gt_ref, loss_ref):
    """Combine per-core partial Grams, row-L2-normalize, MSE -> scalar."""
    gs = jnp.sum(gs_ref[...], axis=0)      # (B, B) f32
    gt = jnp.sum(gt_ref[...], axis=0)
    eps2 = jnp.float32(1e-12) * jnp.float32(1e-12)
    # F.normalize(g, p=2, dim=1): g / max(||g||_2, eps). For s >= 0,
    # max(sqrt(s), eps) == sqrt(max(s, eps^2)) -> a single rsqrt.
    inv_s = lax.rsqrt(jnp.maximum(jnp.sum(gs * gs, axis=1, keepdims=True), eps2))
    inv_t = lax.rsqrt(jnp.maximum(jnp.sum(gt * gt, axis=1, keepdims=True), eps2))
    diff = gs * inv_s - gt * inv_t
    b = gs.shape[0]
    loss_ref[0, 0] = jnp.sum(diff * diff) / jnp.float32(b * b)


_DEF_TK_TARGET = 8192                       # review: 4096-8192 amortizes per-step cost
_DEF_VMEM_BUDGET = 48 * 1024 * 1024         # safe under v7x's 64 MiB/TC physical VMEM


def sp_loss(fm_s, fm_t, *, tk_target=_DEF_TK_TARGET,
            vmem_budget_bytes=_DEF_VMEM_BUDGET):
    """fm_s: (B, Cs, H, W), fm_t: (B, Ct, H, W). Returns scalar f32 loss.

    Pass bf16 feature maps if the surrounding model already runs bf16: the
    kernel feeds the MXU in the input dtype and accumulates in f32, halving
    HBM read traffic on this bandwidth-bound loss.
    """
    B = fm_s.shape[0]
    assert fm_t.shape[0] == B, "student/teacher batch sizes must match"
    fs = fm_s.reshape(B, -1)                # row-major flatten == torch .view(B,-1)
    ft = fm_t.reshape(B, -1)
    Ds, Dt = fs.shape[1], ft.shape[1]
    isz_s, isz_t = fs.dtype.itemsize, ft.dtype.itemsize

    gram_bytes = 2 * B * B * 4              # two resident (B,B) f32 accumulators

    def derive(K):
        P = 2 if K >= 2 else 1              # leading "parallel" axis: v7x's two
        kpc = _cdiv(K, P)                   # TensorCores split the K reduction
        K_total = P * kpc
        tk_s = min(_round_up(_cdiv(Ds, K_total), 128), _round_up(Ds, 128))
        tk_t = min(_round_up(_cdiv(Dt, K_total), 128), _round_up(Dt, 128))
        # Double-buffered input pipeline + (double-buffered) accumulators.
        footprint = 2 * B * (tk_s * isz_s + tk_t * isz_t) + 2 * gram_bytes
        return P, kpc, K_total, tk_s, tk_t, footprint

    K = max(1, _cdiv(max(Ds, Dt), tk_target))
    P, kpc, K_total, tk_s, tk_t, footprint = derive(K)
    while footprint > vmem_budget_bytes and (tk_s > 128 or tk_t > 128):
        K *= 2
        P, kpc, K_total, tk_s, tk_t, footprint = derive(K)

    # Ragged-tail handling, per input:
    #   - final chunk partial                 -> mask in-kernel (no HBM pad)
    #   - some chunks fully out of bounds     -> zero-pad this input (only
    #     happens when it is tiny relative to the other one, so the pad is
    #     negligible HBM traffic)
    def prep(f, D, tk):
        n_chunks = _cdiv(D, tk)
        if n_chunks < K_total:
            return jnp.pad(f, ((0, 0), (0, K_total * tk - D))), False
        return f, (D % tk != 0)

    fs, mask_s = prep(fs, Ds, tk_s)
    ft, mask_t = prep(ft, Dt, tk_t)

    kernel = _make_gram_kernel(Ds, Dt, tk_s, tk_t, kpc, mask_s, mask_t)

    # Raise the scoped-VMEM limit enough for the chosen tile (v5e defaults to
    # 16 MiB) while staying well under v7x's 64 MiB physical VMEM per core.
    vmem_limit = int(min(max(footprint + (8 << 20), 32 << 20), 56 << 20))

    gs_parts, gt_parts = pl.pallas_call(
        kernel,
        out_shape=(
            jax.ShapeDtypeStruct((P, B, B), jnp.float32),
            jax.ShapeDtypeStruct((P, B, B), jnp.float32),
        ),
        grid_spec=pltpu.PrefetchScalarGridSpec(
            num_scalar_prefetch=0,
            grid=(P, kpc),
            in_specs=[
                pl.BlockSpec((B, tk_s), lambda p, k: (0, p * kpc + k)),
                pl.BlockSpec((B, tk_t), lambda p, k: (0, p * kpc + k)),
            ],
            out_specs=[
                # Constant block index across k -> resident accumulator,
                # single writeback per p slice. Leading dim squeezed.
                pl.BlockSpec((None, B, B), lambda p, k: (p, 0, 0)),
                pl.BlockSpec((None, B, B), lambda p, k: (p, 0, 0)),
            ],
        ),
        compiler_params=pltpu.CompilerParams(
            dimension_semantics=("parallel", "arbitrary"),
            vmem_limit_bytes=vmem_limit,
        ),
    )(fs, ft)

    # Tiny (B,B) epilogue: combine partial Grams, normalize rows, MSE.
    loss = pl.pallas_call(
        _epilogue_kernel,
        out_shape=jax.ShapeDtypeStruct((1, 1), jnp.float32),
    )(gs_parts, gt_parts)
    return loss[0, 0]


def _sp_loss_ref(fm_s, fm_t):
    """Pure-JAX reference for sanity checking."""
    B = fm_s.shape[0]
    fs = fm_s.reshape(B, -1).astype(jnp.float32)
    ft = fm_t.reshape(B, -1).astype(jnp.float32)
    gs = fs @ fs.T
    gt = ft @ ft.T
    gs = gs / jnp.maximum(jnp.linalg.norm(gs, axis=1, keepdims=True), 1e-12)
    gt = gt / jnp.maximum(jnp.linalg.norm(gt, axis=1, keepdims=True), 1e-12)
    return jnp.mean((gs - gt) ** 2)


if __name__ == "__main__":
    key = jax.random.PRNGKey(0)
    k1, k2, k3, k4, k5, k6 = jax.random.split(key, 6)

    checks = []

    # 1) Small single-chunk path: batch=2, student C=4, teacher C=8, 16x16.
    fm_s = jax.random.normal(k1, (2, 4, 16, 16), jnp.float32)
    fm_t = jax.random.normal(k2, (2, 8, 16, 16), jnp.float32)
    checks.append((sp_loss(fm_s, fm_t), _sp_loss_ref(fm_s, fm_t), 1e-5, 1e-6))

    # 2) Multi-chunk K-reduction + two-way "parallel" split (K=4, P=2).
    checks.append((sp_loss(fm_s, fm_t, tk_target=512),
                   _sp_loss_ref(fm_s, fm_t), 1e-5, 1e-6))

    # 3) Ragged tails on both inputs -> in-kernel masking, no wrapper pad.
    fm_s3 = jax.random.normal(k3, (2, 10, 8, 8), jnp.float32)    # D = 640
    fm_t3 = jax.random.normal(k4, (2, 14, 8, 8), jnp.float32)    # D = 896
    checks.append((sp_loss(fm_s3, fm_t3, tk_target=512),
                   _sp_loss_ref(fm_s3, fm_t3), 1e-5, 1e-6))

    # 4) Tiny student vs larger teacher -> cheap pad-fallback on the student.
    fm_s4 = jax.random.normal(k5, (2, 1, 4, 4), jnp.float32)     # D = 16
    fm_t4 = jax.random.normal(k6, (2, 8, 16, 16), jnp.float32)   # D = 2048
    checks.append((sp_loss(fm_s4, fm_t4, tk_target=256),
                   _sp_loss_ref(fm_s4, fm_t4), 1e-5, 1e-6))

    # 5) bf16 feature maps (MXU fed in bf16, f32 accumulation).
    fs_bf = fm_s.astype(jnp.bfloat16)
    ft_bf = fm_t.astype(jnp.bfloat16)
    checks.append((sp_loss(fs_bf, ft_bf), _sp_loss_ref(fs_bf, ft_bf), 1e-4, 1e-5))

    for got, want, rtol, atol in checks:
        got = jax.block_until_ready(got)
        assert jnp.isfinite(got), got
        assert jnp.allclose(got, want, rtol=rtol, atol=atol), (got, want)

    print("KERNEL_OK")
</pallas_src>

<mosaic_0001>
module attributes {stable_mosaic.version = 11 : i64} {
  func.func @kernel(%arg0: i32, %arg1: i32, %arg2: memref<2x1024xf32, #tpu.memory_space<vmem>>, %arg3: memref<2x2048xf32, #tpu.memory_space<vmem>>, %arg4: memref<1x2x2xf32, #tpu.memory_space<vmem>>, %arg5: memref<1x2x2xf32, #tpu.memory_space<vmem>>) attributes {dimension_semantics = [#tpu.dimension_semantics<parallel>, #tpu.dimension_semantics<arbitrary>], iteration_bounds = array<i64: 1, 1>, scalar_prefetch = 0 : i64, scratch_operands = 0 : i64, tpu.core_type = #tpu.core_type<tc>, window_params = [{transform_indices = @transform_0, window_bounds = array<i64: 2, 1024>}, {transform_indices = @transform_1, window_bounds = array<i64: 2, 2048>}, {transform_indices = @transform_2, window_bounds = array<i64: 1, 2, 2>}, {transform_indices = @transform_3, window_bounds = array<i64: 1, 2, 2>}]} {
    %c0_i32 = arith.constant 0 : i32
    %0 = arith.cmpi eq, %arg1, %c0_i32 : i32
    %1 = arith.extui %0 : i1 to i32
    %c0_i32_0 = arith.constant 0 : i32
    %2 = arith.cmpi ne, %1, %c0_i32_0 : i32
    scf.if %2 {
      %cst_17 = arith.constant 0.000000e+00 : f32
      %19 = vector.broadcast %cst_17 : f32 to vector<2x2xf32>
      %c0_18 = arith.constant 0 : index
      %c0_19 = arith.constant 0 : index
      %c0_20 = arith.constant 0 : index
      %20 = vector.load %arg4[%c0_18, %c0_19, %c0_20] : memref<1x2x2xf32, #tpu.memory_space<vmem>>, vector<1x2x2xf32>
      %21 = vector.shape_cast %20 : vector<1x2x2xf32> to vector<2x2xf32>
      %22 = vector.shape_cast %19 : vector<2x2xf32> to vector<1x2x2xf32>
      tpu.vector_store %arg4[%c0_18, %c0_19, %c0_20], %22 {strides = array<i32>} : memref<1x2x2xf32, #tpu.memory_space<vmem>>, vector<1x2x2xf32>,
      %cst_21 = arith.constant 0.000000e+00 : f32
      %23 = vector.broadcast %cst_21 : f32 to vector<2x2xf32>
      %c0_22 = arith.constant 0 : index
      %c0_23 = arith.constant 0 : index
      %c0_24 = arith.constant 0 : index
      %24 = vector.load %arg5[%c0_22, %c0_23, %c0_24] : memref<1x2x2xf32, #tpu.memory_space<vmem>>, vector<1x2x2xf32>
      %25 = vector.shape_cast %24 : vector<1x2x2xf32> to vector<2x2xf32>
      %26 = vector.shape_cast %23 : vector<2x2xf32> to vector<1x2x2xf32>
      tpu.vector_store %arg5[%c0_22, %c0_23, %c0_24], %26 {strides = array<i32>} : memref<1x2x2xf32, #tpu.memory_space<vmem>>, vector<1x2x2xf32>,
    } else {
    }
    %c0 = arith.constant 0 : index
    %c0_1 = arith.constant 0 : index
    %3 = vector.load %arg2[%c0, %c0_1] : memref<2x1024xf32, #tpu.memory_space<vmem>>, vector<2x1024xf32>
    %c0_2 = arith.constant 0 : index
    %c0_3 = arith.constant 0 : index
    %4 = vector.load %arg3[%c0_2, %c0_3] : memref<2x2048xf32, #tpu.memory_space<vmem>>, vector<2x2048xf32>
    %c0_4 = arith.constant 0 : index
    %c0_5 = arith.constant 0 : index
    %c0_6 = arith.constant 0 : index
    %5 = vector.load %arg4[%c0_4, %c0_5, %c0_6] : memref<1x2x2xf32, #tpu.memory_space<vmem>>, vector<1x2x2xf32>
    %6 = vector.shape_cast %5 : vector<1x2x2xf32> to vector<2x2xf32>
    %cst = arith.constant dense<0.000000e+00> : vector<2x2xf32>
    %7 = tpu.matmul %3, %3, %cst {dimension_numbers = #tpu.dot_dimension_numbers<[1], [1], [0], [0], [0, 0, 1, 0], [], []>} : vector<2x1024xf32>, vector<2x1024xf32>, vector<2x2xf32> -> vector<2x2xf32>
    %8 = arith.addf %6, %7 : vector<2x2xf32>
    %c0_7 = arith.constant 0 : index
    %c0_8 = arith.constant 0 : index
    %c0_9 = arith.constant 0 : index
    %9 = vector.load %arg4[%c0_7, %c0_8, %c0_9] : memref<1x2x2xf32, #tpu.memory_space<vmem>>, vector<1x2x2xf32>
    %10 = vector.shape_cast %9 : vector<1x2x2xf32> to vector<2x2xf32>
    %11 = vector.shape_cast %8 : vector<2x2xf32> to vector<1x2x2xf32>
    tpu.vector_store %arg4[%c0_7, %c0_8, %c0_9], %11 {strides = array<i32>} : memref<1x2x2xf32, #tpu.memory_space<vmem>>, vector<1x2x2xf32>,
    %c0_10 = arith.constant 0 : index
    %c0_11 = arith.constant 0 : index
    %c0_12 = arith.constant 0 : index
    %12 = vector.load %arg5[%c0_10, %c0_11, %c0_12] : memref<1x2x2xf32, #tpu.memory_space<vmem>>, vector<1x2x2xf32>
    %13 = vector.shape_cast %12 : vector<1x2x2xf32> to vector<2x2xf32>
    %cst_13 = arith.constant dense<0.000000e+00> : vector<2x2xf32>
    %14 = tpu.matmul %4, %4, %cst_13 {dimension_numbers = #tpu.dot_dimension_numbers<[1], [1], [0], [0], [0, 0, 1, 0], [], []>} : vector<2x2048xf32>, vector<2x2048xf32>, vector<2x2xf32> -> vector<2x2xf32>
    %15 = arith.addf %13, %14 : vector<2x2xf32>
    %c0_14 = arith.constant 0 : index
    %c0_15 = arith.constant 0 : index
    %c0_16 = arith.constant 0 : index
    %16 = vector.load %arg5[%c0_14, %c0_15, %c0_16] : memref<1x2x2xf32, #tpu.memory_space<vmem>>, vector<1x2x2xf32>
    %17 = vector.shape_cast %16 : vector<1x2x2xf32> to vector<2x2xf32>
    %18 = vector.shape_cast %15 : vector<2x2xf32> to vector<1x2x2xf32>
    tpu.vector_store %arg5[%c0_14, %c0_15, %c0_16], %18 {strides = array<i32>} : memref<1x2x2xf32, #tpu.memory_space<vmem>>, vector<1x2x2xf32>,
    return
  }
  func.func @transform_0(%arg0: i32, %arg1: i32) -> (i32, i32) {
    %c1_i32 = arith.constant 1 : i32
    %0 = arith.muli %arg0, %c1_i32 : i32
    %1 = arith.addi %0, %arg1 : i32
    %c0_i32 = arith.constant 0 : i32
    %c0_i32_0 = arith.constant 0 : i32
    return %c0_i32, %1 : i32, i32
  }
  func.func @transform_1(%arg0: i32, %arg1: i32) -> (i32, i32) {
    %c1_i32 = arith.constant 1 : i32
    %0 = arith.muli %arg0, %c1_i32 : i32
    %1 = arith.addi %0, %arg1 : i32
    %c0_i32 = arith.constant 0 : i32
    %c0_i32_0 = arith.constant 0 : i32
    return %c0_i32, %1 : i32, i32
  }
  func.func @transform_2(%arg0: i32, %arg1: i32) -> (i32, i32, i32) {
    %c0_i32 = arith.constant 0 : i32
    %c0_i32_0 = arith.constant 0 : i32
    %c0_i32_1 = arith.constant 0 : i32
    return %arg0, %c0_i32, %c0_i32_0 : i32, i32, i32
  }
  func.func @transform_3(%arg0: i32, %arg1: i32) -> (i32, i32, i32) {
    %c0_i32 = arith.constant 0 : i32
    %c0_i32_0 = arith.constant 0 : i32
    %c0_i32_1 = arith.constant 0 : i32
    return %arg0, %c0_i32, %c0_i32_0 : i32, i32, i32
  }
}

</mosaic_0001>

<bundles_post_ra>
// kernel: tpu_custom_call.1
= control target key start
LH: loop header
LB: loop body
LE: loop exit
PB: predicated region body
PF: predicated region fallthrough
CT: control target
= control target key end

     0   :  { %9 = vsyncpa [#allocation3], 0  ;;  %s1259_s0 = inlined_call_operand.hbm [shape: f32[2,1024], index: 0, kind: input, shape index: {}]   ;;  %s1260_s1 = inlined_call_operand.hbm [shape: f32[2,2048], index: 1, kind: input, shape index: {}]   ;;  %s1261_s2 = inlined_call_operand.hbm [shape: f32[1,2,2], index: 2, kind: output, shape index: {0}]   ;;  %s1262_s3 = inlined_call_operand.hbm [shape: f32[1,2,2], index: 3, kind: output, shape index: {1}]  }
   0x1   :  { %10 = vsyncpa [#allocation6], 0 }
   0x2   :  { %11 = vsyncpa [#allocation4], 0 }
   0x3   :  { %12 = vsyncpa [#allocation9], 0  ;;  %s1181_s12 = smov [#allocation2]   ;;  %s1182_s14 = smov [#allocation5]  }
   0x4   :  { %s23_s13 = sshll.u32 %s1181_s12, 4  ;;  %s37_s15 = sshll.u32 %s1182_s14, 4  ;;  %s24_s13 = int_to_ptr.vmem [resolvable:$true] %s23_s13  ;;  %s38_s15 = int_to_ptr.vmem [resolvable:$true] %s37_s15 }
   0x5   :  { %s1085_s18 = scalar_lea.hbm %s1259_s0, 256 }
   0x6   :  { %p1086_p0 = scmp.ne.s32.totalorder %s1259_s0, %s1085_s18  ;;  %p1089_p1 = scmp.lt.u32.totalorder %s1085_s18, %s1259_s0 }
   0x8   :  { %p1091_p2 = pnand %p1089_p1, %p1086_p0 }
   0xa   :  { %1094 = shalt.err (!%p1091_p2)
}
   0xb   :  { %s1095_s23 = scalar_lea.vmem %s24_s13, 256  ;;  %p1100_p4 = scmp.lt.s32.totalorder %s24_s13, %s24_s13 }
   0xc   :  { %p1096_p3 = scmp.ne.s32.totalorder %s24_s13, %s1095_s23  ;;  %p1101_p5 = scmp.lt.s32.totalorder %s1095_s23, %s1095_s23 }
   0xe   :  { %p1102_p6 = por %p1101_p5, %p1100_p4 }
  0x10   :  { %p1103_p7 = pnand %p1102_p6, %p1096_p3 }
  0x12   :  { %1106 = shalt.err (!%p1103_p7)
}
  0x13   :  { %26 = dma.hbm_to_vmem [thread:$0]  %s1259_s0, 256, %s24_s13, [#allocation3]  }
  0x14   :  { %s1107_s28 = scalar_lea.hbm %s1260_s1, 512 }
  0x15   :  { %p1108_p8 = scmp.ne.s32.totalorder %s1260_s1, %s1107_s28  ;;  %p1111_p9 = scmp.lt.u32.totalorder %s1107_s28, %s1260_s1 }
  0x17   :  { %p1113_p10 = pnand %p1111_p9, %p1108_p8 }
  0x19   :  { %1116 = shalt.err (!%p1113_p10)
}
  0x1a   :  { %s1117_s6 = scalar_lea.vmem %s38_s15, 512  ;;  %p1122_p12 = scmp.lt.s32.totalorder %s38_s15, %s38_s15 }
  0x1b   :  { %p1118_p11 = scmp.ne.s32.totalorder %s38_s15, %s1117_s6  ;;  %p1123_p13 = scmp.lt.s32.totalorder %s1117_s6, %s1117_s6 }
  0x1d   :  { %p1124_p0 = por %p1123_p13, %p1122_p12 }
  0x1f   :  { %p1125_p1 = pnand %p1124_p0, %p1118_p11 }
  0x21   :  { %1128 = shalt.err (!%p1125_p1)
}
  0x22   :  { %40 = dma.hbm_to_vmem [thread:$0]  %s1260_s1, 512, %s38_s15, [#allocation6]  }
  0x23   :  { %1173 = dma.done.wait [#allocation3], 256  }
  0x24   :  { %1174 = vsyncadd [#allocation3], 4294967040 }
  0x25   :  { %1175 = dma.done.wait [#allocation6], 512  }
  0x26   :  { %1176 = vsyncadd [#allocation6], 4294966784  ;;  %v71_v0 = vlaneseq  ;;  %v1183_v1 = vmov 1983009808   ;;  %v58_v6 = vld [vmem:[#allocation2] sm:$0xff]  ;;  %v59_v7 = vld [vmem:[#allocation2 + $0x8] sm:$0xff] }
  0x27   :  { %v69_v2 = vunpack.c.l.s4 %v1183_v1  ;;  %v60_v8 = vld [vmem:[#allocation5] sm:$0xff]  ;;  %v67_v10 = vcombine.high %v58_v6, %v58_v6  ;;  %v84_v12 = vcombine.high %v59_v7, %v59_v7  ;;  %v61_v13 = vld [vmem:[#allocation5 + $0x8] sm:$0xff]  ;;  %v62_v24 = vld [vmem:[#allocation5 + $0x10] sm:$0xff]  ;;  %vm55_vm0 = vcmask 9216   ;;  %s1185_s1 = smov [#allocation7]  }
  0x28   :  { %v72_v3 = vshrl.u32 %v71_v0, 7  ;;  %v397_v15 = vcombine.high %v60_v8, %v60_v8  ;;  %v414_v20 = vcombine.high %v61_v13, %v61_v13  ;;  %v431_v29 = vcombine.high %v62_v24, %v62_v24  ;;  %v63_v30 = vld [vmem:[#allocation5 + $0x18] sm:$0xff]  ;;  %s1049_s8 = sshll.u32 %s1185_s1, 4  ;;  %s1050_s8 = int_to_ptr.vmem [resolvable:$true] %s1049_s8 }
  0x29   :  { %v70_v4 = vunpack.c.0.s8 %v69_v2  ;;  %v448_v35 = vcombine.high %v63_v30, %v63_v30  ;;  %v1184_v42 = vmov 0.0   ;;  %s1129_s9 = scalar_lea.vmem %s1050_s8, 32  ;;  %p1134_p3 = scmp.lt.s32.totalorder %s1050_s8, %s1050_s8 }
  0x2a   :  { %56 = vst.msk [vmem:[#allocation7] sm:$0x3] %vm55_vm0, %v1184_v42  ;;  %57 = vst.msk [vmem:[#allocation8] sm:$0x3] %vm55_vm0, %v1184_v42  ;;  %p1130_p2 = scmp.ne.s32.totalorder %s1050_s8, %s1129_s9  ;;  %p1135_p4 = scmp.lt.s32.totalorder %s1129_s9, %s1129_s9 }
  0x2b   :  { %v73_v5 = vsub.s32 %v70_v4, %v72_v3 }
  0x2c   :  { %p1136_p5 = por %p1135_p4, %p1134_p3 }
  0x2d   :  { %v74_v9 = vrot.slane %v58_v6, %v73_v5  ;;  %v91_v11 = vrot.slane %v59_v7, %v73_v5  ;;  %v404_v14 = vrot.slane %v60_v8, %v73_v5  ;;  %v81_v17 = vrot.slane %v67_v10, %v73_v5 }
  0x2e   :  { %v98_v19 = vrot.slane %v84_v12, %v73_v5  ;;  %v411_v23 = vrot.slane %v397_v15, %v73_v5  ;;  %v421_v26 = vrot.slane %v61_v13, %v73_v5  ;;  %v428_v28 = vrot.slane %v414_v20, %v73_v5  ;;  %p1137_p6 = pnand %p1136_p5, %p1130_p2 }
  0x2f   :  { %v82_v16 = vcombine.high %v74_v9, %v74_v9  ;;  %v99_v18 = vcombine.high %v91_v11, %v91_v11  ;;  %v83_v21 = vcombine.high %v81_v17, %v81_v17  ;;  %v412_v25 = vcombine.high %v404_v14, %v404_v14 }
  0x30   :  { %v100_v22 = vcombine.high %v98_v19, %v98_v19  ;;  %v413_v27 = vcombine.high %v411_v23, %v411_v23  ;;  %v429_v31 = vcombine.high %v421_v26, %v421_v26  ;;  %v438_v32 = vrot.slane %v62_v24, %v73_v5 }
  0x31   :  { %109 = vmatprep.subr.mxu0 %v82_v16  ;;  %173 = vmatprep.mubr.f32.mxu0 %v82_v16  ;;  %v430_v33 = vcombine.high %v428_v28, %v428_v28  ;;  %v445_v34 = vrot.slane %v431_v29, %v73_v5  ;;  %v455_v37 = vrot.slane %v63_v30, %v73_v5  ;;  %v64_v51 = vld [vmem:[#allocation7] sm:$0x3] }
  0x32   :  { %110 = vmatpush1.xpose.msra.mxu0 %v74_v9  ;;  %179 = vmatprep.subr.mxu1 %v83_v21  ;;  %v446_v36 = vcombine.high %v438_v32, %v438_v32  ;;  %v462_v39 = vrot.slane %v448_v35, %v73_v5 }
  0x33   :  { %249 = vmatprep.subr.mxu0 %v99_v18  ;;  %180 = vmatpush1.xpose.msra.mxu1 %v81_v17  ;;  %v447_v38 = vcombine.high %v445_v34, %v445_v34  ;;  %v463_v40 = vcombine.high %v455_v37, %v455_v37 }
  0x34   :  { %243 = vmatprep.mubr.f32.mxu1 %v83_v21  ;;  %319 = vmatprep.subr.mxu1 %v100_v22  ;;  %v464_v41 = vcombine.high %v462_v39, %v462_v39 }
  0x35   :  { %174 = vmatmul.mubr.f32.vlgmr.msra.gmra.mrb[0].mxu0 %v74_v9 }
  0x36   :  { %250 = vmatpush1.xpose.msra.mxu0 %v91_v11  ;;  %313 = vmatprep.mubr.f32.mxu0 %v99_v18 }
  0x37   :  { %244 = vmatmul.mubr.f32.vlgmr.msra.gmra.mrb[0].mxu1 %v81_v17  ;;  %481 = vmatprep.subr.mxu0 %v412_v25 }
  0x38   :  { %320 = vmatpush1.xpose.msra.mxu1 %v98_v19  ;;  %383 = vmatprep.mubr.f32.mxu1 %v100_v22 }
  0x39   :  { %314 = vmatmul.mubr.f32.vlgmr.msra.gmra.mrb[2].mxu0 %v91_v11  ;;  %551 = vmatprep.subr.mxu1 %v413_v27 }
  0x3a   :  { %482 = vmatpush1.xpose.msra.mxu0 %v404_v14  ;;  %545 = vmatprep.mubr.f32.mxu0 %v412_v25 }
  0x3b   :  { %384 = vmatmul.mubr.f32.vlgmr.msra.gmra.mrb[2].mxu1 %v98_v19  ;;  %621 = vmatprep.subr.mxu0 %v429_v31 }
  0x3c   :  { %552 = vmatpush1.xpose.msra.mxu1 %v411_v23  ;;  %615 = vmatprep.mubr.f32.mxu1 %v413_v27 }
  0x3d   :  { %546 = vmatmul.mubr.f32.vlgmr.msra.gmra.mrb[4].mxu0 %v404_v14  ;;  %691 = vmatprep.subr.mxu1 %v430_v33 }
  0x3e   :  { %622 = vmatpush1.xpose.msra.mxu0 %v421_v26  ;;  %685 = vmatprep.mubr.f32.mxu0 %v429_v31 }
  0x3f   :  { %616 = vmatmul.mubr.f32.vlgmr.msra.gmra.mrb[4].mxu1 %v411_v23  ;;  %761 = vmatprep.subr.mxu0 %v446_v36 }
  0x40   :  { %692 = vmatpush1.xpose.msra.mxu1 %v428_v28  ;;  %755 = vmatprep.mubr.f32.mxu1 %v430_v33 }
  0x41   :  { %686 = vmatmul.mubr.f32.vlgmr.msra.gmra.mrb[6].mxu0 %v421_v26  ;;  %831 = vmatprep.subr.mxu1 %v447_v38 }
  0x42   :  { %762 = vmatpush1.xpose.msra.mxu0 %v438_v32  ;;  %825 = vmatprep.mubr.f32.mxu0 %v446_v36 }
  0x43   :  { %756 = vmatmul.mubr.f32.vlgmr.msra.gmra.mrb[6].mxu1 %v428_v28  ;;  %901 = vmatprep.subr.mxu0 %v463_v40 }
  0x44   :  { %832 = vmatpush1.xpose.msra.mxu1 %v445_v34  ;;  %895 = vmatprep.mubr.f32.mxu1 %v447_v38 }
  0x45   :  { %826 = vmatmul.mubr.f32.vlgmr.msra.gmra.mrb[8].mxu0 %v438_v32  ;;  %971 = vmatprep.subr.mxu1 %v464_v41 }
  0x46   :  { %902 = vmatpush1.xpose.msra.mxu0 %v455_v37  ;;  %965 = vmatprep.mubr.f32.mxu0 %v463_v40 }
  0x47   :  { %896 = vmatmul.mubr.f32.vlgmr.msra.gmra.mrb[8].mxu1 %v445_v34 }
  0x48   :  { %972 = vmatpush1.xpose.msra.mxu1 %v462_v39  ;;  %1035 = vmatprep.mubr.f32.mxu1 %v464_v41 }
  0x49   :  { %966 = vmatmul.mubr.f32.vlgmr.msra.gmra.mrb[10].mxu0 %v455_v37 }
  0x4b   :  { %1036 = vmatmul.mubr.f32.vlgmr.msra.gmra.mrb[10].mxu1 %v462_v39 }
 0x108   :  { %v175_v43 = vpop.f32.mrb[0].mxu0 }
 0x109   :  { %v177_v44 = vpop.f32.mrb[1].mxu0 }
 0x10a   :  { %v245_v45 = vpop.f32.mrb[0].mxu1 }
 0x10b   :  { %v246_v46 = vadd.f32 %v245_v45, %v175_v43  ;;  %v247_v47 = vpop.f32.mrb[1].mxu1 }
 0x10c   :  { %v315_v48 = vpop.f32.mrb[2].mxu0 }
 0x10d   :  { %v316_v49 = vadd.f32 %v315_v48, %v246_v46  ;;  %v317_v50 = vpop.f32.mrb[3].mxu0 }
 0x10e   :  { %v385_v52 = vpop.f32.mrb[2].mxu1 }
 0x10f   :  { %v386_v53 = vadd.f32 %v385_v52, %v316_v49  ;;  %v387_v54 = vpop.f32.mrb[3].mxu1 }
 0x110   :  { %v547_v55 = vpop.f32.mrb[4].mxu0 }
 0x111   :  { %v389_v56 = vadd.f32 %v386_v53, %v64_v51  ;;  %v549_v57 = vpop.f32.mrb[5].mxu0 }
 0x112   :  { %v617_v58 = vpop.f32.mrb[4].mxu1 }
 0x113   :  { %391 = vst.msk [vmem:[#allocation7] sm:$0x3] %vm55_vm0, %v389_v56  ;;  %v618_v59 = vadd.f32 %v617_v58, %v547_v55  ;;  %v619_v60 = vpop.f32.mrb[5].mxu1 }
 0x114   :  { %v687_v61 = vpop.f32.mrb[6].mxu0 }
 0x115   :  { %1140 = shalt.err (!%p1137_p6)
}
 0x116   :  { %s1141_s12 = scalar_lea.hbm %s1261_s2, 32 }
 0x117   :  { %p1142_p7 = scmp.ne.s32.totalorder %s1261_s2, %s1141_s12  ;;  %p1145_p8 = scmp.lt.u32.totalorder %s1141_s12, %s1261_s2 }
 0x119   :  { %p1147_p9 = pnand %p1145_p8, %p1142_p7 }
 0x11b   :  { %1150 = shalt.err (!%p1147_p9)
}
 0x11c   :  { %1052 = dma.vmem_to_hbm [thread:$0]  %s1050_s8, 32, %s1261_s2, [#allocation4]   ;;  %v688_v62 = vadd.f32 %v687_v61, %v618_v59  ;;  %v689_v63 = vpop.f32.mrb[7].mxu0  ;;  %v757_v0 = vpop.f32.mrb[6].mxu1  ;;  %v392_v12 = vld [vmem:[#allocation8] sm:$0x3] }
 0x11d   :  { %v759_v2 = vpop.f32.mrb[7].mxu1  ;;  %v827_v3 = vpop.f32.mrb[8].mxu0  ;;  %s1186_s19 = smov [#allocation8]  }
 0x11e   :  { %v758_v1 = vadd.f32 %v757_v0, %v688_v62  ;;  %v829_v5 = vpop.f32.mrb[9].mxu0  ;;  %v897_v6 = vpop.f32.mrb[8].mxu1  ;;  %s1059_s20 = sshll.u32 %s1186_s19, 4  ;;  %s1060_s20 = int_to_ptr.vmem [resolvable:$true] %s1059_s20 }
 0x11f   :  { %v899_v8 = vpop.f32.mrb[9].mxu1  ;;  %v967_v9 = vpop.f32.mrb[10].mxu0  ;;  %s1151_s2 = scalar_lea.vmem %s1060_s20, 32  ;;  %p1156_p11 = scmp.lt.s32.totalorder %s1060_s20, %s1060_s20 }
 0x120   :  { %v828_v4 = vadd.f32 %v827_v3, %v758_v1  ;;  %v969_v11 = vpop.f32.mrb[11].mxu0  ;;  %v1037_v13 = vpop.f32.mrb[10].mxu1  ;;  %p1152_p10 = scmp.ne.s32.totalorder %s1060_s20, %s1151_s2  ;;  %p1157_p12 = scmp.lt.s32.totalorder %s1151_s2, %s1151_s2 }
 0x121   :  { %v1039_v15 = vpop.f32.mrb[11].mxu1 }
 0x122   :  { %v898_v7 = vadd.f32 %v897_v6, %v828_v4  ;;  %p1158_p13 = por %p1157_p12, %p1156_p11 }
 0x124   :  { %v968_v10 = vadd.f32 %v967_v9, %v898_v7  ;;  %p1159_p0 = pnand %p1158_p13, %p1152_p10 }
 0x126   :  { %v1038_v14 = vadd.f32 %v1037_v13, %v968_v10 }
 0x128   :  { %v1041_v16 = vadd.f32 %v1038_v14, %v392_v12 }
 0x12a   :  { %1042 = vst.msk [vmem:[#allocation8] sm:$0x3] %vm55_vm0, %v1041_v16 }
 0x12b   :  { %1162 = shalt.err (!%p1159_p0)
}
 0x12c   :  { %s1163_s23 = scalar_lea.hbm %s1262_s3, 32 }
 0x12d   :  { %p1164_p1 = scmp.ne.s32.totalorder %s1262_s3, %s1163_s23  ;;  %p1167_p2 = scmp.lt.u32.totalorder %s1163_s23, %s1262_s3 }
 0x12f   :  { %p1169_p3 = pnand %p1167_p2, %p1164_p1 }
 0x131   :  { %1172 = shalt.err (!%p1169_p3)
}
 0x132   :  { %1062 = dma.vmem_to_hbm [thread:$0]  %s1060_s20, 32, %s1262_s3, [#allocation9]  }
 0x133   :  { %1177 = dma.done.wait [#allocation4], 32  }
 0x134   :  { %1178 = vsyncadd [#allocation4], 4294967264 }
 0x135   :  { %1179 = dma.done.wait [#allocation9], 32  }
 0x136   :  { %1180 = vsyncadd [#allocation9], 4294967264 }
 0x137   :  { %1069 = vsyncpa [#allocation3], 1 }
 0x138   :  { %1070 = vsyncpa [#allocation6], 1 }
 0x139   :  { %1071 = vsyncpa [#allocation4], 1 }
 0x13a   :  { %1072 = vsyncpa [#allocation9], 1 }

</bundles_post_ra>
